<compile_context>
chip_gen: v5e
topology: v5e:2x2
jax: 0.10.0
libtpu: 0.0.40
codegen_flags: <defaults>
</compile_context>

<pallas_src>
import functools

import jax
import jax.numpy as jnp
from jax import lax
from jax.experimental import pallas as pl
from jax.experimental.pallas import tpu as pltpu


def _round_up(x, m):
    return ((x + m - 1) // m) * m


def _pad_cast(a, rows, cols, dtype):
    """Zero-pad a 2-D array to (rows, cols) and cast; no-op if already there."""
    if a.shape == (rows, cols) and a.dtype == dtype:
        return a
    out = jnp.zeros((rows, cols), dtype)
    return out.at[: a.shape[0], : a.shape[1]].set(a.astype(dtype))


def _gcn_prop_kernel(*refs, activation, fuse_w, valid_cols):
    """Tiled H = A_hat @ F (optionally @ W) + b with fused activation.

    Grid = (row_tiles, k_tiles); k (reduction) is the last grid axis.  acc_ref
    is a per-row-tile f32 accumulator resident across k.  Bias, the optional
    right-multiply by W, and the activation run once in the final-k epilogue,
    keeping the steady-state body pure MXU + DMA.
    """
    if fuse_w:
        a_ref, f_ref, w_ref, b_ref, o_ref, acc_ref = refs
    else:
        a_ref, f_ref, b_ref, o_ref, acc_ref = refs
        w_ref = None

    k = pl.program_id(1)

    @pl.when(k == 0)
    def _init():
        acc_ref[...] = jnp.zeros_like(acc_ref)

    # bf16 x bf16 -> f32 accumulate on the MXU.
    acc_ref[...] += jnp.dot(
        a_ref[...], f_ref[...], preferred_element_type=jnp.float32
    )

    @pl.when(k == pl.num_programs(1) - 1)
    def _finalize():
        h = acc_ref[...]
        if fuse_w:
            h = jnp.dot(
                h.astype(jnp.bfloat16), w_ref[...],
                preferred_element_type=jnp.float32,
            )
        h = h + b_ref[...]
        if activation == "relu":
            h = jnp.maximum(h, 0.0)
        elif activation == "log_softmax":
            # Padded feature columns must not contribute to the normalizer.
            col = lax.broadcasted_iota(jnp.int32, h.shape, 1)
            h = jnp.where(col < valid_cols, h, jnp.float32(-1e30))
            m = jnp.max(h, axis=1, keepdims=True)
            s = h - m
            h = s - jnp.log(jnp.sum(jnp.exp(s), axis=1, keepdims=True))
        o_ref[...] = h.astype(o_ref.dtype)


def _gcn_layer(a_p, x, w, b, activation, *, tm, tk, out_dtype):
    """One fused GCNConv layer on the (row-)padded graph.

    a_p : (n_pad, n_pad) bf16 normalized adjacency (padded once, shared).
    x   : (n or n_pad, f_in) node features.
    Returns the padded output (n_pad, f_out_pad) in `out_dtype`.
    """
    n_pad = a_p.shape[0]
    f_in, f_out = w.shape
    f_in_pad = _round_up(f_in, 128)
    f_out_pad = _round_up(f_out, 128)

    # Matmul association: propagate the narrower (padded) feature matrix
    # through the O(N^2) loop; fold the other matmul outside of it.
    fuse_w = f_in_pad <= f_out_pad
    if fuse_w:
        f_prop = f_in_pad
        feat = _pad_cast(x, n_pad, f_prop, jnp.bfloat16)
    else:
        f_prop = f_out_pad
        # XW is O(N*F_in*F_out): compute exactly once, outside the tiled
        # O(N^2) propagation loop (plain XLA matmul is fine at this size).
        xw = jnp.dot(
            x.astype(jnp.float32), w, preferred_element_type=jnp.float32
        )
        feat = _pad_cast(xw, n_pad, f_prop, jnp.bfloat16)

    b_p = _pad_cast(b.reshape(1, f_out), 1, f_out_pad, jnp.float32)

    grid = (n_pad // tm, n_pad // tk)

    in_specs = [
        pl.BlockSpec((tm, tk), lambda i, k: (i, k)),       # A_hat tile
        pl.BlockSpec((tk, f_prop), lambda i, k: (k, 0)),   # X or XW k-slab
    ]
    operands = [a_p, feat]
    if fuse_w:
        w_p = _pad_cast(w, f_prop, f_out_pad, jnp.bfloat16)
        in_specs.append(
            pl.BlockSpec((f_prop, f_out_pad), lambda i, k: (0, 0))
        )
        operands.append(w_p)
    in_specs.append(pl.BlockSpec((1, f_out_pad), lambda i, k: (0, 0)))  # bias
    operands.append(b_p)

    kernel = functools.partial(
        _gcn_prop_kernel,
        activation=activation,
        fuse_w=fuse_w,
        valid_cols=f_out,
    )

    return pl.pallas_call(
        kernel,
        out_shape=jax.ShapeDtypeStruct((n_pad, f_out_pad), out_dtype),
        grid_spec=pltpu.PrefetchScalarGridSpec(
            num_scalar_prefetch=0,
            grid=grid,
            in_specs=in_specs,
            out_specs=pl.BlockSpec((tm, f_out_pad), lambda i, k: (i, 0)),
            scratch_shapes=[pltpu.VMEM((tm, f_prop), jnp.float32)],
        ),
        compiler_params=pltpu.CompilerParams(
            dimension_semantics=("parallel", "arbitrary"),
        ),
    )(*operands)


def build_norm_adj(edge_index, num_nodes):
    """Dense D^-1/2 (A + I) D^-1/2 from edge_index [2, E] (src, dst)."""
    loops = jnp.arange(num_nodes, dtype=edge_index.dtype)
    src = jnp.concatenate([edge_index[0], loops])
    dst = jnp.concatenate([edge_index[1], loops])
    a = jnp.zeros((num_nodes, num_nodes), jnp.float32).at[dst, src].set(1.0)
    deg = a.sum(axis=1)  # in-degree incl. self loop
    dinv = jnp.where(deg > 0, 1.0 / jnp.sqrt(deg), 0.0)
    return dinv[:, None] * a * dinv[None, :]


def init_params(key, num_features, hidden_channels, num_classes):
    k1, k2 = jax.random.split(key)

    def glorot(k, fan_in, fan_out):
        limit = jnp.sqrt(6.0 / (fan_in + fan_out))
        return jax.random.uniform(
            k, (fan_in, fan_out), jnp.float32, -limit, limit
        )

    return {
        "w1": glorot(k1, num_features, hidden_channels),
        "b1": jnp.zeros((hidden_channels,), jnp.float32),
        "w2": glorot(k2, num_features if False else hidden_channels, num_classes),
        "b2": jnp.zeros((num_classes,), jnp.float32),
    }


def gcn_forward(params, x, edge_index):
    """Forward pass of the GCN module (eval mode: dropout is identity)."""
    n = x.shape[0]
    a_hat = build_norm_adj(edge_index, n)

    # Tiling for the O(N^2) propagation; pad/cast A_hat to bf16 exactly once
    # and share it between both layers.
    tile = min(512, _round_up(n, 128))
    n_pad = _round_up(n, tile)
    a_p = _pad_cast(a_hat, n_pad, n_pad, jnp.bfloat16)

    # Layer 1: relu(A_hat @ X @ W1 + b1); intermediate stays bf16 + row-padded
    # so layer 2 consumes it with zero re-padding / re-casting.
    h = _gcn_layer(
        a_p, x, params["w1"], params["b1"], "relu",
        tm=tile, tk=tile, out_dtype=jnp.bfloat16,
    )
    # TODO(synk): training-mode dropout (p=0.5) could be fused here via
    # pltpu.prng_seed/prng_random_bits; eval mode makes it the identity.
    out = _gcn_layer(
        a_p, h, params["w2"], params["b2"], "log_softmax",
        tm=tile, tk=tile, out_dtype=jnp.float32,
    )

    num_classes = params["w2"].shape[1]
    return out[:n, :num_classes]


if __name__ == "__main__":
    num_nodes = 8
    num_features = 16
    hidden_channels = 32
    num_classes = 8
    num_edges = 16

    key = jax.random.PRNGKey(0)
    kx, ke, kp = jax.random.split(key, 3)

    x = jax.random.normal(kx, (num_nodes, num_features), jnp.float32)
    edge_index = jax.random.randint(
        ke, (2, num_edges), 0, num_nodes, dtype=jnp.int32
    )
    params = init_params(kp, num_features, hidden_channels, num_classes)

    out = jax.jit(gcn_forward)(params, x, edge_index)
    out = jax.block_until_ready(out)

    assert out.shape == (num_nodes, num_classes)
    assert bool(jnp.all(jnp.isfinite(out)))
    # log-softmax rows should exponentiate-sum to 1
    assert bool(jnp.allclose(jnp.exp(out).sum(axis=1), 1.0, atol=1e-4))

    print("KERNEL_OK")
</pallas_src>

<mosaic_0001>
module attributes {stable_mosaic.version = 11 : i64} {
  func.func @_gcn_prop_kernel(%arg0: i32, %arg1: i32, %arg2: memref<128x128xbf16, #tpu.memory_space<vmem>>, %arg3: memref<128x128xbf16, #tpu.memory_space<vmem>>, %arg4: memref<128x128xbf16, #tpu.memory_space<vmem>>, %arg5: memref<1x128xf32, #tpu.memory_space<vmem>>, %arg6: memref<128x128xbf16, #tpu.memory_space<vmem>>, %arg7: memref<128x128xf32, #tpu.memory_space<vmem>>) attributes {dimension_semantics = [#tpu.dimension_semantics<parallel>, #tpu.dimension_semantics<arbitrary>], iteration_bounds = array<i64: 1, 1>, scalar_prefetch = 0 : i64, scratch_operands = 1 : i64, tpu.core_type = #tpu.core_type<tc>, window_params = [{transform_indices = @transform_0, window_bounds = array<i64: 128, 128>}, {transform_indices = @transform_1, window_bounds = array<i64: 128, 128>}, {pipeline_mode = #tpu.pipeline_mode<synchronous>, transform_indices = @transform_2, window_bounds = array<i64: 128, 128>}, {pipeline_mode = #tpu.pipeline_mode<synchronous>, transform_indices = @transform_3, window_bounds = array<i64: 1, 128>}, {transform_indices = @transform_4, window_bounds = array<i64: 128, 128>}]} {
    %c0_i32 = arith.constant 0 : i32
    %0 = arith.cmpi eq, %arg1, %c0_i32 : i32
    %1 = arith.extui %0 : i1 to i32
    %c0_i32_0 = arith.constant 0 : i32
    %2 = arith.cmpi ne, %1, %c0_i32_0 : i32
    scf.if %2 {
      %cst_10 = arith.constant 0.000000e+00 : f32
      %12 = vector.broadcast %cst_10 : f32 to vector<128x128xf32>
      %c0_11 = arith.constant 0 : index
      %c0_12 = arith.constant 0 : index
      %13 = vector.load %arg7[%c0_11, %c0_12] : memref<128x128xf32, #tpu.memory_space<vmem>>, vector<128x128xf32>
      tpu.vector_store %arg7[%c0_11, %c0_12], %12 {strides = array<i32>} : memref<128x128xf32, #tpu.memory_space<vmem>>, vector<128x128xf32>,
    } else {
    }
    %c0 = arith.constant 0 : index
    %c0_1 = arith.constant 0 : index
    %3 = vector.load %arg7[%c0, %c0_1] : memref<128x128xf32, #tpu.memory_space<vmem>>, vector<128x128xf32>
    %c0_2 = arith.constant 0 : index
    %c0_3 = arith.constant 0 : index
    %4 = vector.load %arg2[%c0_2, %c0_3] : memref<128x128xbf16, #tpu.memory_space<vmem>>, vector<128x128xbf16>
    %c0_4 = arith.constant 0 : index
    %c0_5 = arith.constant 0 : index
    %5 = vector.load %arg3[%c0_4, %c0_5] : memref<128x128xbf16, #tpu.memory_space<vmem>>, vector<128x128xbf16>
    %cst = arith.constant dense<0.000000e+00> : vector<128x128xf32>
    %6 = tpu.matmul %4, %5, %cst {dimension_numbers = #tpu.dot_dimension_numbers<[1], [0], [0], [1], [0, 0, 1, 1], [], []>} : vector<128x128xbf16>, vector<128x128xbf16>, vector<128x128xf32> -> vector<128x128xf32>
    %7 = arith.addf %3, %6 : vector<128x128xf32>
    %c0_6 = arith.constant 0 : index
    %c0_7 = arith.constant 0 : index
    %8 = vector.load %arg7[%c0_6, %c0_7] : memref<128x128xf32, #tpu.memory_space<vmem>>, vector<128x128xf32>
    tpu.vector_store %arg7[%c0_6, %c0_7], %7 {strides = array<i32>} : memref<128x128xf32, #tpu.memory_space<vmem>>, vector<128x128xf32>,
    %c0_i32_8 = arith.constant 0 : i32
    %9 = arith.cmpi eq, %arg1, %c0_i32_8 : i32
    %10 = arith.extui %9 : i1 to i32
    %c0_i32_9 = arith.constant 0 : i32
    %11 = arith.cmpi ne, %10, %c0_i32_9 : i32
    scf.if %11 {
      %c0_10 = arith.constant 0 : index
      %c0_11 = arith.constant 0 : index
      %12 = vector.load %arg7[%c0_10, %c0_11] : memref<128x128xf32, #tpu.memory_space<vmem>>, vector<128x128xf32>
      %13 = arith.truncf %12 : vector<128x128xf32> to vector<128x128xbf16>
      %c0_12 = arith.constant 0 : index
      %c0_13 = arith.constant 0 : index
      %14 = vector.load %arg4[%c0_12, %c0_13] : memref<128x128xbf16, #tpu.memory_space<vmem>>, vector<128x128xbf16>
      %cst_14 = arith.constant dense<0.000000e+00> : vector<128x128xf32>
      %15 = tpu.matmul %13, %14, %cst_14 {dimension_numbers = #tpu.dot_dimension_numbers<[1], [0], [0], [1], [0, 0, 1, 1], [], []>} : vector<128x128xbf16>, vector<128x128xbf16>, vector<128x128xf32> -> vector<128x128xf32>
      %c0_15 = arith.constant 0 : index
      %c0_16 = arith.constant 0 : index
      %16 = vector.load %arg5[%c0_15, %c0_16] : memref<1x128xf32, #tpu.memory_space<vmem>>, vector<1x128xf32>
      %17 = vector.broadcast %16 : vector<1x128xf32> to vector<128x128xf32>
      %18 = arith.addf %15, %17 : vector<128x128xf32>
      %cst_17 = arith.constant 0.000000e+00 : f32
      %19 = vector.broadcast %cst_17 : f32 to vector<128x128xf32>
      %20 = arith.maximumf %18, %19 : vector<128x128xf32>
      %21 = arith.truncf %20 : vector<128x128xf32> to vector<128x128xbf16>
      %c0_18 = arith.constant 0 : index
      %c0_19 = arith.constant 0 : index
      %22 = vector.load %arg6[%c0_18, %c0_19] : memref<128x128xbf16, #tpu.memory_space<vmem>>, vector<128x128xbf16>
      tpu.vector_store %arg6[%c0_18, %c0_19], %21 {strides = array<i32>} : memref<128x128xbf16, #tpu.memory_space<vmem>>, vector<128x128xbf16>,
    } else {
    }
    return
  }
  func.func @transform_0(%arg0: i32, %arg1: i32) -> (i32, i32) {
    %c0_i32 = arith.constant 0 : i32
    return %arg0, %arg1 : i32, i32
  }
  func.func @transform_1(%arg0: i32, %arg1: i32) -> (i32, i32) {
    %c0_i32 = arith.constant 0 : i32
    %c0_i32_0 = arith.constant 0 : i32
    return %arg1, %c0_i32 : i32, i32
  }
  func.func @transform_2(%arg0: i32, %arg1: i32) -> (i32, i32) {
    %c0_i32 = arith.constant 0 : i32
    %c0_i32_0 = arith.constant 0 : i32
    %c0_i32_1 = arith.constant 0 : i32
    return %c0_i32, %c0_i32_0 : i32, i32
  }
  func.func @transform_3(%arg0: i32, %arg1: i32) -> (i32, i32) {
    %c0_i32 = arith.constant 0 : i32
    %c0_i32_0 = arith.constant 0 : i32
    %c0_i32_1 = arith.constant 0 : i32
    return %c0_i32, %c0_i32_0 : i32, i32
  }
  func.func @transform_4(%arg0: i32, %arg1: i32) -> (i32, i32) {
    %c0_i32 = arith.constant 0 : i32
    %c0_i32_0 = arith.constant 0 : i32
    return %arg0, %c0_i32 : i32, i32
  }
}

module attributes {stable_mosaic.version = 11 : i64} {
  func.func @_gcn_prop_kernel(%arg0: i32, %arg1: i32, %arg2: memref<128x128xbf16, #tpu.memory_space<vmem>>, %arg3: memref<128x128xbf16, #tpu.memory_space<vmem>>, %arg4: memref<128x128xbf16, #tpu.memory_space<vmem>>, %arg5: memref<1x128xf32, #tpu.memory_space<vmem>>, %arg6: memref<128x128xf32, #tpu.memory_space<vmem>>, %arg7: memref<128x128xf32, #tpu.memory_space<vmem>>) attributes {dimension_semantics = [#tpu.dimension_semantics<parallel>, #tpu.dimension_semantics<arbitrary>], iteration_bounds = array<i64: 1, 1>, scalar_prefetch = 0 : i64, scratch_operands = 1 : i64, tpu.core_type = #tpu.core_type<tc>, window_params = [{transform_indices = @transform_0, window_bounds = array<i64: 128, 128>}, {transform_indices = @transform_1, window_bounds = array<i64: 128, 128>}, {pipeline_mode = #tpu.pipeline_mode<synchronous>, transform_indices = @transform_2, window_bounds = array<i64: 128, 128>}, {pipeline_mode = #tpu.pipeline_mode<synchronous>, transform_indices = @transform_3, window_bounds = array<i64: 1, 128>}, {transform_indices = @transform_4, window_bounds = array<i64: 128, 128>}]} {
    %c0_i32 = arith.constant 0 : i32
    %0 = arith.cmpi eq, %arg1, %c0_i32 : i32
    %1 = arith.extui %0 : i1 to i32
    %c0_i32_0 = arith.constant 0 : i32
    %2 = arith.cmpi ne, %1, %c0_i32_0 : i32
    scf.if %2 {
      %cst_10 = arith.constant 0.000000e+00 : f32
      %12 = vector.broadcast %cst_10 : f32 to vector<128x128xf32>
      %c0_11 = arith.constant 0 : index
      %c0_12 = arith.constant 0 : index
      %13 = vector.load %arg7[%c0_11, %c0_12] : memref<128x128xf32, #tpu.memory_space<vmem>>, vector<128x128xf32>
      tpu.vector_store %arg7[%c0_11, %c0_12], %12 {strides = array<i32>} : memref<128x128xf32, #tpu.memory_space<vmem>>, vector<128x128xf32>,
    } else {
    }
    %c0 = arith.constant 0 : index
    %c0_1 = arith.constant 0 : index
    %3 = vector.load %arg7[%c0, %c0_1] : memref<128x128xf32, #tpu.memory_space<vmem>>, vector<128x128xf32>
    %c0_2 = arith.constant 0 : index
    %c0_3 = arith.constant 0 : index
    %4 = vector.load %arg2[%c0_2, %c0_3] : memref<128x128xbf16, #tpu.memory_space<vmem>>, vector<128x128xbf16>
    %c0_4 = arith.constant 0 : index
    %c0_5 = arith.constant 0 : index
    %5 = vector.load %arg3[%c0_4, %c0_5] : memref<128x128xbf16, #tpu.memory_space<vmem>>, vector<128x128xbf16>
    %cst = arith.constant dense<0.000000e+00> : vector<128x128xf32>
    %6 = tpu.matmul %4, %5, %cst {dimension_numbers = #tpu.dot_dimension_numbers<[1], [0], [0], [1], [0, 0, 1, 1], [], []>} : vector<128x128xbf16>, vector<128x128xbf16>, vector<128x128xf32> -> vector<128x128xf32>
    %7 = arith.addf %3, %6 : vector<128x128xf32>
    %c0_6 = arith.constant 0 : index
    %c0_7 = arith.constant 0 : index
    %8 = vector.load %arg7[%c0_6, %c0_7] : memref<128x128xf32, #tpu.memory_space<vmem>>, vector<128x128xf32>
    tpu.vector_store %arg7[%c0_6, %c0_7], %7 {strides = array<i32>} : memref<128x128xf32, #tpu.memory_space<vmem>>, vector<128x128xf32>,
    %c0_i32_8 = arith.constant 0 : i32
    %9 = arith.cmpi eq, %arg1, %c0_i32_8 : i32
    %10 = arith.extui %9 : i1 to i32
    %c0_i32_9 = arith.constant 0 : i32
    %11 = arith.cmpi ne, %10, %c0_i32_9 : i32
    scf.if %11 {
      %c0_10 = arith.constant 0 : index
      %c0_11 = arith.constant 0 : index
      %12 = vector.load %arg7[%c0_10, %c0_11] : memref<128x128xf32, #tpu.memory_space<vmem>>, vector<128x128xf32>
      %13 = arith.truncf %12 : vector<128x128xf32> to vector<128x128xbf16>
      %c0_12 = arith.constant 0 : index
      %c0_13 = arith.constant 0 : index
      %14 = vector.load %arg4[%c0_12, %c0_13] : memref<128x128xbf16, #tpu.memory_space<vmem>>, vector<128x128xbf16>
      %cst_14 = arith.constant dense<0.000000e+00> : vector<128x128xf32>
      %15 = tpu.matmul %13, %14, %cst_14 {dimension_numbers = #tpu.dot_dimension_numbers<[1], [0], [0], [1], [0, 0, 1, 1], [], []>} : vector<128x128xbf16>, vector<128x128xbf16>, vector<128x128xf32> -> vector<128x128xf32>
      %c0_15 = arith.constant 0 : index
      %c0_16 = arith.constant 0 : index
      %16 = vector.load %arg5[%c0_15, %c0_16] : memref<1x128xf32, #tpu.memory_space<vmem>>, vector<1x128xf32>
      %17 = vector.broadcast %16 : vector<1x128xf32> to vector<128x128xf32>
      %18 = arith.addf %15, %17 : vector<128x128xf32>
      %19 = tpu.iota {dimensions = array<i32: 1>} : vector<128x128xi32>
      %c8_i32 = arith.constant 8 : i32
      %20 = vector.broadcast %c8_i32 : i32 to vector<128x128xi32>
      %21 = arith.cmpi slt, %19, %20 : vector<128x128xi32>
      %cst_17 = arith.constant -1.000000e+30 : f32
      %22 = vector.broadcast %cst_17 : f32 to vector<128x128xf32>
      %23 = arith.select %21, %18, %22 : vector<128x128xi1>, vector<128x128xf32>
      %cst_18 = arith.constant dense<0xFF800000> : vector<128xf32>
      %24 = vector.multi_reduction <maximumf>, %23, %cst_18 [1] : vector<128x128xf32> to vector<128xf32>
      %25 = vector.shape_cast %24 : vector<128xf32> to vector<128x1xf32>
      %26 = vector.broadcast %25 : vector<128x1xf32> to vector<128x128xf32>
      %27 = arith.subf %23, %26 : vector<128x128xf32>
      %28 = math.exp %27 : vector<128x128xf32>
      %cst_19 = arith.constant dense<0.000000e+00> : vector<128xf32>
      %29 = vector.multi_reduction <add>, %28, %cst_19 [1] : vector<128x128xf32> to vector<128xf32>
      %30 = vector.shape_cast %29 : vector<128xf32> to vector<128x1xf32>
      %31 = math.log %30 : vector<128x1xf32>
      %32 = vector.broadcast %31 : vector<128x1xf32> to vector<128x128xf32>
      %33 = arith.subf %27, %32 : vector<128x128xf32>
      %c0_20 = arith.constant 0 : index
      %c0_21 = arith.constant 0 : index
      %34 = vector.load %arg6[%c0_20, %c0_21] : memref<128x128xf32, #tpu.memory_space<vmem>>, vector<128x128xf32>
      tpu.vector_store %arg6[%c0_20, %c0_21], %33 {strides = array<i32>} : memref<128x128xf32, #tpu.memory_space<vmem>>, vector<128x128xf32>,
    } else {
    }
    return
  }
  func.func @transform_0(%arg0: i32, %arg1: i32) -> (i32, i32) {
    %c0_i32 = arith.constant 0 : i32
    return %arg0, %arg1 : i32, i32
  }
  func.func @transform_1(%arg0: i32, %arg1: i32) -> (i32, i32) {
    %c0_i32 = arith.constant 0 : i32
    %c0_i32_0 = arith.constant 0 : i32
    return %arg1, %c0_i32 : i32, i32
  }
  func.func @transform_2(%arg0: i32, %arg1: i32) -> (i32, i32) {
    %c0_i32 = arith.constant 0 : i32
    %c0_i32_0 = arith.constant 0 : i32
    %c0_i32_1 = arith.constant 0 : i32
    return %c0_i32, %c0_i32_0 : i32, i32
  }
  func.func @transform_3(%arg0: i32, %arg1: i32) -> (i32, i32) {
    %c0_i32 = arith.constant 0 : i32
    %c0_i32_0 = arith.constant 0 : i32
    %c0_i32_1 = arith.constant 0 : i32
    return %c0_i32, %c0_i32_0 : i32, i32
  }
  func.func @transform_4(%arg0: i32, %arg1: i32) -> (i32, i32) {
    %c0_i32 = arith.constant 0 : i32
    %c0_i32_0 = arith.constant 0 : i32
    return %arg0, %c0_i32 : i32, i32
  }
}

</mosaic_0001>

<bundles_post_ra>
// kernel: gcn_forward.2
= control target key start
LH: loop header
LB: loop body
LE: loop exit
PB: predicated region body
PF: predicated region fallthrough
CT: control target
= control target key end

     0   :  { %s766_s1 = inlined_call_operand.vmem [shape: bf16[128,128], index: 1, kind: input, shape index: {}]   ;;  %s767_s0 = inlined_call_operand.vmem [shape: bf16[128,128], index: 0, kind: input, shape index: {}]   ;;  %s768_s2 = inlined_call_operand.vmem [shape: bf16[128,128], index: 2, kind: input, shape index: {}]   ;;  %s769_s3 = inlined_call_operand.vmem [shape: f32[1,128], index: 3, kind: input, shape index: {}]   ;;  %s770_s4 = inlined_call_operand.vmem [shape: bf16[128,128], index: 4, kind: output, shape index: {}]  }
   0x1   :  { %v569_v0 = vld [vmem:[%s766_s1 + $0x38] sm:$0xff]  ;;  %v568_v1 = vld [vmem:[%s766_s1 + $0x30] sm:$0xff]  ;;  %v567_v2 = vld [vmem:[%s766_s1 + $0x28] sm:$0xff] }
   0x2   :  { %181 = vmatpush.bf16.msra.mxu0 %v569_v0  ;;  %625 = vmatpush.bf16.msra.mxu2 %v569_v0  ;;  %v566_v3 = vld [vmem:[%s766_s1 + $0x20] sm:$0xff]  ;;  %v565_v4 = vld [vmem:[%s766_s1 + $0x18] sm:$0xff]  ;;  %v564_v5 = vld [vmem:[%s766_s1 + $0x10] sm:$0xff] }
   0x3   :  { %v563_v6 = vld [vmem:[%s766_s1 + $0x8] sm:$0xff]  ;;  %v562_v7 = vld [vmem:[%s766_s1] sm:$0xff]  ;;  %v577_v12 = vld [vmem:[%s768_s2 + $0x38] sm:$0xff] }
   0x4   :  { %v554_v8 = vld [vmem:[%s767_s0] sm:$0xff]  ;;  %v555_v10 = vld [vmem:[%s767_s0 + $0x8] sm:$0xff]  ;;  %357 = vmatpush.bf16.msra.mxu1 %v577_v12  ;;  %v576_v13 = vld [vmem:[%s768_s2 + $0x30] sm:$0xff]  ;;  %633 = vmatpush.bf16.msra.mxu3 %v577_v12 }
   0x5   :  { %v558_v9 = vld [vmem:[%s767_s0 + $0x20] sm:$0xff]  ;;  %v559_v11 = vld [vmem:[%s767_s0 + $0x28] sm:$0xff]  ;;  %v556_v16 = vld [vmem:[%s767_s0 + $0x10] sm:$0xff] }
   0x6   :  { %182 = vmatpush.bf16.msra.mxu0 %v568_v1  ;;  %626 = vmatpush.bf16.msra.mxu2 %v568_v1  ;;  %v575_v14 = vld [vmem:[%s768_s2 + $0x28] sm:$0xff]  ;;  %v574_v15 = vld [vmem:[%s768_s2 + $0x20] sm:$0xff]  ;;  %v560_v17 = vld [vmem:[%s767_s0 + $0x30] sm:$0xff] }
   0x7   :  { %v573_v18 = vld [vmem:[%s768_s2 + $0x18] sm:$0xff]  ;;  %v572_v21 = vld [vmem:[%s768_s2 + $0x10] sm:$0xff]  ;;  %v571_v22 = vld [vmem:[%s768_s2 + $0x8] sm:$0xff] }
   0x8   :  { %358 = vmatpush.bf16.msra.mxu1 %v576_v13  ;;  %634 = vmatpush.bf16.msra.mxu3 %v576_v13  ;;  %v557_v19 = vld [vmem:[%s767_s0 + $0x18] sm:$0xff]  ;;  %v570_v23 = vld [vmem:[%s768_s2] sm:$0xff] }
   0x9   :  { %v561_v20 = vld [vmem:[%s767_s0 + $0x38] sm:$0xff]  ;;  %v641_v49 = vld [vmem:[%s769_s3] ss:$0 sm:$0xff] }
   0xa   :  { %183 = vmatpush.bf16.msra.mxu0 %v567_v2  ;;  %627 = vmatpush.bf16.msra.mxu2 %v567_v2 }
   0xc   :  { %359 = vmatpush.bf16.msra.mxu1 %v575_v14  ;;  %635 = vmatpush.bf16.msra.mxu3 %v575_v14 }
   0xe   :  { %184 = vmatpush.bf16.msra.mxu0 %v566_v3  ;;  %628 = vmatpush.bf16.msra.mxu2 %v566_v3 }
  0x10   :  { %360 = vmatpush.bf16.msra.mxu1 %v574_v15  ;;  %636 = vmatpush.bf16.msra.mxu3 %v574_v15 }
  0x12   :  { %185 = vmatpush.bf16.msra.mxu0 %v565_v4  ;;  %629 = vmatpush.bf16.msra.mxu2 %v565_v4 }
  0x14   :  { %361 = vmatpush.bf16.msra.mxu1 %v573_v18  ;;  %637 = vmatpush.bf16.msra.mxu3 %v573_v18 }
  0x16   :  { %186 = vmatpush.bf16.msra.mxu0 %v564_v5  ;;  %630 = vmatpush.bf16.msra.mxu2 %v564_v5 }
  0x18   :  { %362 = vmatpush.bf16.msra.mxu1 %v572_v21  ;;  %638 = vmatpush.bf16.msra.mxu3 %v572_v21 }
  0x1a   :  { %187 = vmatpush.bf16.msra.mxu0 %v563_v6  ;;  %631 = vmatpush.bf16.msra.mxu2 %v563_v6 }
  0x1c   :  { %363 = vmatpush.bf16.msra.mxu1 %v571_v22  ;;  %639 = vmatpush.bf16.msra.mxu3 %v571_v22 }
  0x1e   :  { %188 = vmatpush.bf16.msra.mxu0 %v562_v7  ;;  %632 = vmatpush.bf16.msra.mxu2 %v562_v7 }
  0x20   :  { %364 = vmatpush.bf16.msra.mxu1 %v570_v23  ;;  %640 = vmatpush.bf16.msra.mxu3 %v570_v23 }
  0x21   :  { %189 = vmatmul.bf16.vlgmr.msra.gmra.mxu0 %v554_v8  ;;  %209 = vmatmul.bf16.vlgmr.msra.gmra.mxu2 %v558_v9 }
  0x31   :  { %194 = vmatmul.bf16.gmra.mxu0 %v555_v10  ;;  %214 = vmatmul.bf16.gmra.mxu2 %v559_v11 }
  0x41   :  { %199 = vmatmul.bf16.gmra.mxu0 %v556_v16  ;;  %219 = vmatmul.bf16.gmra.mxu2 %v560_v17 }
  0x51   :  { %204 = vmatmul.bf16.gmra.mxu0 %v557_v19  ;;  %224 = vmatmul.bf16.gmra.mxu2 %v561_v20 }
  0x9e   :  { %v190_v24 = vpop.f32.mrf.mxu0 }
  0xa4   :  { %v210_v25 = vpop.f32.mrf.mxu2 }
  0xa6   :  { %v192_v26 = vpop.f32.mrf.mxu0 }
  0xa7   :  { %v281_v27 = vpack.c.bf16 %v192_v26, %v190_v24 }
  0xa9   :  { %365 = vmatmul.bf16.vlgmr.msra.gmra.mxu1 %v281_v27 }
  0xac   :  { %v212_v28 = vpop.f32.mrf.mxu2 }
  0xad   :  { %v285_v29 = vpack.c.bf16 %v212_v28, %v210_v25 }
  0xae   :  { %v195_v30 = vpop.f32.mrf.mxu0 }
  0xaf   :  { %385 = vmatmul.bf16.vlgmr.msra.gmra.mxu3 %v285_v29 }
  0xb4   :  { %v215_v31 = vpop.f32.mrf.mxu2 }
  0xb6   :  { %v197_v32 = vpop.f32.mrf.mxu0 }
  0xb7   :  { %v282_v33 = vpack.c.bf16 %v197_v32, %v195_v30 }
  0xb9   :  { %370 = vmatmul.bf16.gmra.mxu1 %v282_v33 }
  0xbc   :  { %v217_v34 = vpop.f32.mrf.mxu2 }
  0xbd   :  { %v286_v35 = vpack.c.bf16 %v217_v34, %v215_v31 }
  0xbe   :  { %v200_v36 = vpop.f32.mrf.mxu0 }
  0xbf   :  { %390 = vmatmul.bf16.gmra.mxu3 %v286_v35 }
  0xc4   :  { %v220_v37 = vpop.f32.mrf.mxu2 }
  0xc6   :  { %v202_v38 = vpop.f32.mrf.mxu0 }
  0xc7   :  { %v283_v39 = vpack.c.bf16 %v202_v38, %v200_v36 }
  0xc9   :  { %375 = vmatmul.bf16.gmra.mxu1 %v283_v39 }
  0xcc   :  { %v222_v40 = vpop.f32.mrf.mxu2 }
  0xcd   :  { %v287_v41 = vpack.c.bf16 %v222_v40, %v220_v37 }
  0xce   :  { %v205_v42 = vpop.f32.mrf.mxu0 }
  0xcf   :  { %395 = vmatmul.bf16.gmra.mxu3 %v287_v41 }
  0xd4   :  { %v225_v43 = vpop.f32.mrf.mxu2 }
  0xd6   :  { %v207_v44 = vpop.f32.mrf.mxu0 }
  0xd7   :  { %v284_v45 = vpack.c.bf16 %v207_v44, %v205_v42 }
  0xd9   :  { %380 = vmatmul.bf16.gmra.mxu1 %v284_v45 }
  0xdc   :  { %v227_v46 = vpop.f32.mrf.mxu2 }
  0xdd   :  { %v288_v47 = vpack.c.bf16 %v227_v46, %v225_v43 }
  0xdf   :  { %400 = vmatmul.bf16.gmra.mxu3 %v288_v47 }
 0x126   :  { %v366_v48 = vpop.f32.mrf.mxu1 }
 0x127   :  { %v367_v50 = vadd.f32 %v641_v49, %v366_v48 }
 0x129   :  { %v406_v53 = vmax.f32 %v367_v50, 0.0 }
 0x12e   :  { %v368_v51 = vpop.f32.mrf.mxu1 }
 0x12f   :  { %v369_v52 = vadd.f32 %v641_v49, %v368_v51 }
 0x131   :  { %v407_v54 = vmax.f32 %v369_v52, 0.0 }
 0x132   :  { %v386_v55 = vpop.f32.mrf.mxu3 }
 0x133   :  { %v581_v56 = vpack.c.bf16 %v407_v54, %v406_v53  ;;  %v387_v58 = vadd.f32 %v641_v49, %v386_v55 }
 0x135   :  { %582 = vst [vmem:[%s770_s4] sm:$0xff] %v581_v56   ;;  %v414_v61 = vmax.f32 %v387_v58, 0.0 }
 0x136   :  { %v371_v57 = vpop.f32.mrf.mxu1 }
 0x137   :  { %v372_v62 = vadd.f32 %v641_v49, %v371_v57 }
 0x139   :  { %v408_v3 = vmax.f32 %v372_v62, 0.0 }
 0x13a   :  { %v388_v59 = vpop.f32.mrf.mxu3 }
 0x13b   :  { %v389_v60 = vadd.f32 %v641_v49, %v388_v59 }
 0x13d   :  { %v415_v63 = vmax.f32 %v389_v60, 0.0 }
 0x13e   :  { %v373_v0 = vpop.f32.mrf.mxu1 }
 0x13f   :  { %v601_v1 = vpack.c.bf16 %v415_v63, %v414_v61  ;;  %v374_v2 = vadd.f32 %v641_v49, %v373_v0 }
 0x141   :  { %621 = vst [vmem:[%s770_s4 + $0x20] sm:$0xff] %v601_v1   ;;  %v409_v4 = vmax.f32 %v374_v2, 0.0 }
 0x142   :  { %v391_v5 = vpop.f32.mrf.mxu3 }
 0x143   :  { %v586_v6 = vpack.c.bf16 %v409_v4, %v408_v3  ;;  %v392_v8 = vadd.f32 %v641_v49, %v391_v5 }
 0x145   :  { %618 = vst [vmem:[%s770_s4 + $0x8] sm:$0xff] %v586_v6   ;;  %v416_v11 = vmax.f32 %v392_v8, 0.0 }
 0x146   :  { %v376_v7 = vpop.f32.mrf.mxu1 }
 0x147   :  { %v377_v12 = vadd.f32 %v641_v49, %v376_v7 }
 0x149   :  { %v410_v17 = vmax.f32 %v377_v12, 0.0 }
 0x14a   :  { %v393_v9 = vpop.f32.mrf.mxu3 }
 0x14b   :  { %v394_v10 = vadd.f32 %v641_v49, %v393_v9 }
 0x14d   :  { %v417_v13 = vmax.f32 %v394_v10, 0.0 }
 0x14e   :  { %v378_v14 = vpop.f32.mrf.mxu1 }
 0x14f   :  { %v606_v15 = vpack.c.bf16 %v417_v13, %v416_v11  ;;  %v379_v16 = vadd.f32 %v641_v49, %v378_v14 }
 0x151   :  { %622 = vst [vmem:[%s770_s4 + $0x28] sm:$0xff] %v606_v15   ;;  %v411_v18 = vmax.f32 %v379_v16, 0.0 }
 0x152   :  { %v396_v19 = vpop.f32.mrf.mxu3 }
 0x153   :  { %v591_v20 = vpack.c.bf16 %v411_v18, %v410_v17  ;;  %v397_v22 = vadd.f32 %v641_v49, %v396_v19 }
 0x155   :  { %619 = vst [vmem:[%s770_s4 + $0x10] sm:$0xff] %v591_v20   ;;  %v418_v25 = vmax.f32 %v397_v22, 0.0 }
 0x156   :  { %v381_v21 = vpop.f32.mrf.mxu1 }
 0x157   :  { %v382_v26 = vadd.f32 %v641_v49, %v381_v21 }
 0x159   :  { %v412_v31 = vmax.f32 %v382_v26, 0.0 }
 0x15a   :  { %v398_v23 = vpop.f32.mrf.mxu3 }
 0x15b   :  { %v399_v24 = vadd.f32 %v641_v49, %v398_v23 }
 0x15d   :  { %v419_v27 = vmax.f32 %v399_v24, 0.0 }
 0x15e   :  { %v383_v28 = vpop.f32.mrf.mxu1 }
 0x15f   :  { %v611_v29 = vpack.c.bf16 %v419_v27, %v418_v25  ;;  %v384_v30 = vadd.f32 %v641_v49, %v383_v28 }
 0x161   :  { %623 = vst [vmem:[%s770_s4 + $0x30] sm:$0xff] %v611_v29   ;;  %v413_v32 = vmax.f32 %v384_v30, 0.0 }
 0x162   :  { %v401_v33 = vpop.f32.mrf.mxu3 }
 0x163   :  { %v596_v34 = vpack.c.bf16 %v413_v32, %v412_v31  ;;  %v402_v35 = vadd.f32 %v641_v49, %v401_v33 }
 0x165   :  { %620 = vst [vmem:[%s770_s4 + $0x18] sm:$0xff] %v596_v34   ;;  %v420_v38 = vmax.f32 %v402_v35, 0.0 }
 0x16a   :  { %v403_v36 = vpop.f32.mrf.mxu3 }
 0x16b   :  { %v404_v37 = vadd.f32 %v641_v49, %v403_v36 }
 0x16d   :  { %v421_v39 = vmax.f32 %v404_v37, 0.0 }
 0x16f   :  { %v616_v40 = vpack.c.bf16 %v421_v39, %v420_v38 }
 0x171   :  { %624 = vst [vmem:[%s770_s4 + $0x38] sm:$0xff] %v616_v40  }

// kernel: gcn_forward.3
= control target key start
LH: loop header
LB: loop body
LE: loop exit
PB: predicated region body
PF: predicated region fallthrough
CT: control target
= control target key end

     0   :  { %v406_v48 = vlaneseq  ;;  %s1135_s1 = inlined_call_operand.vmem [shape: bf16[128,128], index: 1, kind: input, shape index: {}]   ;;  %s1136_s0 = inlined_call_operand.vmem [shape: bf16[128,128], index: 0, kind: input, shape index: {}]   ;;  %s1137_s2 = inlined_call_operand.vmem [shape: bf16[128,128], index: 2, kind: input, shape index: {}]   ;;  %s1138_s3 = inlined_call_operand.vmem [shape: f32[1,128], index: 3, kind: input, shape index: {}]   ;;  %s1139_s4 = inlined_call_operand.vmem [shape: f32[128,128], index: 4, kind: output, shape index: {}]  }
   0x1   :  { %v716_v0 = vld [vmem:[%s1135_s1 + $0x38] sm:$0xff]  ;;  %v715_v1 = vld [vmem:[%s1135_s1 + $0x30] sm:$0xff]  ;;  %v714_v2 = vld [vmem:[%s1135_s1 + $0x28] sm:$0xff] }
   0x2   :  { %181 = vmatpush.bf16.msra.mxu0 %v716_v0  ;;  %725 = vmatpush.bf16.msra.mxu2 %v716_v0  ;;  %v713_v3 = vld [vmem:[%s1135_s1 + $0x20] sm:$0xff]  ;;  %v712_v4 = vld [vmem:[%s1135_s1 + $0x18] sm:$0xff]  ;;  %v711_v5 = vld [vmem:[%s1135_s1 + $0x10] sm:$0xff]  ;;  %v903_v49 = vand.u32 127, %v406_v48 }
   0x3   :  { %v710_v6 = vld [vmem:[%s1135_s1 + $0x8] sm:$0xff]  ;;  %v709_v7 = vld [vmem:[%s1135_s1] sm:$0xff]  ;;  %v724_v12 = vld [vmem:[%s1137_s2 + $0x38] sm:$0xff] }
   0x4   :  { %v701_v8 = vld [vmem:[%s1136_s0] sm:$0xff]  ;;  %v702_v10 = vld [vmem:[%s1136_s0 + $0x8] sm:$0xff]  ;;  %357 = vmatpush.bf16.msra.mxu1 %v724_v12  ;;  %v723_v13 = vld [vmem:[%s1137_s2 + $0x30] sm:$0xff]  ;;  %733 = vmatpush.bf16.msra.mxu3 %v724_v12  ;;  %vm408_vm0 = vcmp.lt.s32.totalorder %v903_v49, 8 }
   0x5   :  { %v705_v9 = vld [vmem:[%s1136_s0 + $0x20] sm:$0xff]  ;;  %v706_v11 = vld [vmem:[%s1136_s0 + $0x28] sm:$0xff]  ;;  %v703_v16 = vld [vmem:[%s1136_s0 + $0x10] sm:$0xff] }
   0x6   :  { %182 = vmatpush.bf16.msra.mxu0 %v715_v1  ;;  %726 = vmatpush.bf16.msra.mxu2 %v715_v1  ;;  %v722_v14 = vld [vmem:[%s1137_s2 + $0x28] sm:$0xff]  ;;  %v721_v15 = vld [vmem:[%s1137_s2 + $0x20] sm:$0xff]  ;;  %v707_v17 = vld [vmem:[%s1136_s0 + $0x30] sm:$0xff] }
   0x7   :  { %v720_v18 = vld [vmem:[%s1137_s2 + $0x18] sm:$0xff]  ;;  %v719_v21 = vld [vmem:[%s1137_s2 + $0x10] sm:$0xff]  ;;  %v718_v22 = vld [vmem:[%s1137_s2 + $0x8] sm:$0xff] }
   0x8   :  { %358 = vmatpush.bf16.msra.mxu1 %v723_v13  ;;  %734 = vmatpush.bf16.msra.mxu3 %v723_v13  ;;  %v704_v19 = vld [vmem:[%s1136_s0 + $0x18] sm:$0xff]  ;;  %v717_v23 = vld [vmem:[%s1137_s2] sm:$0xff] }
   0x9   :  { %v708_v20 = vld [vmem:[%s1136_s0 + $0x38] sm:$0xff]  ;;  %v908_v50 = vld [vmem:[%s1138_s3] ss:$0 sm:$0xff] }
   0xa   :  { %183 = vmatpush.bf16.msra.mxu0 %v714_v2  ;;  %727 = vmatpush.bf16.msra.mxu2 %v714_v2 }
   0xc   :  { %359 = vmatpush.bf16.msra.mxu1 %v722_v14  ;;  %735 = vmatpush.bf16.msra.mxu3 %v722_v14 }
   0xe   :  { %184 = vmatpush.bf16.msra.mxu0 %v713_v3  ;;  %728 = vmatpush.bf16.msra.mxu2 %v713_v3 }
  0x10   :  { %360 = vmatpush.bf16.msra.mxu1 %v721_v15  ;;  %736 = vmatpush.bf16.msra.mxu3 %v721_v15 }
  0x12   :  { %185 = vmatpush.bf16.msra.mxu0 %v712_v4  ;;  %729 = vmatpush.bf16.msra.mxu2 %v712_v4 }
  0x14   :  { %361 = vmatpush.bf16.msra.mxu1 %v720_v18  ;;  %737 = vmatpush.bf16.msra.mxu3 %v720_v18 }
  0x16   :  { %186 = vmatpush.bf16.msra.mxu0 %v711_v5  ;;  %730 = vmatpush.bf16.msra.mxu2 %v711_v5 }
  0x18   :  { %362 = vmatpush.bf16.msra.mxu1 %v719_v21  ;;  %738 = vmatpush.bf16.msra.mxu3 %v719_v21 }
  0x1a   :  { %187 = vmatpush.bf16.msra.mxu0 %v710_v6  ;;  %731 = vmatpush.bf16.msra.mxu2 %v710_v6 }
  0x1c   :  { %363 = vmatpush.bf16.msra.mxu1 %v718_v22  ;;  %739 = vmatpush.bf16.msra.mxu3 %v718_v22 }
  0x1e   :  { %188 = vmatpush.bf16.msra.mxu0 %v709_v7  ;;  %732 = vmatpush.bf16.msra.mxu2 %v709_v7 }
  0x20   :  { %364 = vmatpush.bf16.msra.mxu1 %v717_v23  ;;  %740 = vmatpush.bf16.msra.mxu3 %v717_v23 }
  0x21   :  { %189 = vmatmul.bf16.vlgmr.msra.gmra.mxu0 %v701_v8  ;;  %209 = vmatmul.bf16.vlgmr.msra.gmra.mxu2 %v705_v9 }
  0x31   :  { %194 = vmatmul.bf16.gmra.mxu0 %v702_v10  ;;  %214 = vmatmul.bf16.gmra.mxu2 %v706_v11 }
  0x41   :  { %199 = vmatmul.bf16.gmra.mxu0 %v703_v16  ;;  %219 = vmatmul.bf16.gmra.mxu2 %v707_v17 }
  0x51   :  { %204 = vmatmul.bf16.gmra.mxu0 %v704_v19  ;;  %224 = vmatmul.bf16.gmra.mxu2 %v708_v20 }
  0x9e   :  { %v190_v24 = vpop.f32.mrf.mxu0 }
  0xa4   :  { %v210_v25 = vpop.f32.mrf.mxu2 }
  0xa6   :  { %v192_v26 = vpop.f32.mrf.mxu0 }
  0xa7   :  { %v281_v27 = vpack.c.bf16 %v192_v26, %v190_v24 }
  0xa9   :  { %365 = vmatmul.bf16.vlgmr.msra.gmra.mxu1 %v281_v27 }
  0xac   :  { %v212_v28 = vpop.f32.mrf.mxu2 }
  0xad   :  { %v285_v29 = vpack.c.bf16 %v212_v28, %v210_v25 }
  0xae   :  { %v195_v30 = vpop.f32.mrf.mxu0 }
  0xaf   :  { %385 = vmatmul.bf16.vlgmr.msra.gmra.mxu3 %v285_v29 }
  0xb4   :  { %v215_v31 = vpop.f32.mrf.mxu2 }
  0xb6   :  { %v197_v32 = vpop.f32.mrf.mxu0 }
  0xb7   :  { %v282_v33 = vpack.c.bf16 %v197_v32, %v195_v30 }
  0xb9   :  { %370 = vmatmul.bf16.gmra.mxu1 %v282_v33 }
  0xbc   :  { %v217_v34 = vpop.f32.mrf.mxu2 }
  0xbd   :  { %v286_v35 = vpack.c.bf16 %v217_v34, %v215_v31 }
  0xbe   :  { %v200_v36 = vpop.f32.mrf.mxu0 }
  0xbf   :  { %390 = vmatmul.bf16.gmra.mxu3 %v286_v35 }
  0xc4   :  { %v220_v37 = vpop.f32.mrf.mxu2 }
  0xc6   :  { %v202_v38 = vpop.f32.mrf.mxu0 }
  0xc7   :  { %v283_v39 = vpack.c.bf16 %v202_v38, %v200_v36 }
  0xc9   :  { %375 = vmatmul.bf16.gmra.mxu1 %v283_v39 }
  0xcc   :  { %v222_v40 = vpop.f32.mrf.mxu2 }
  0xcd   :  { %v287_v41 = vpack.c.bf16 %v222_v40, %v220_v37 }
  0xce   :  { %v205_v42 = vpop.f32.mrf.mxu0 }
  0xcf   :  { %395 = vmatmul.bf16.gmra.mxu3 %v287_v41 }
  0xd4   :  { %v225_v43 = vpop.f32.mrf.mxu2 }
  0xd6   :  { %v207_v44 = vpop.f32.mrf.mxu0 }
  0xd7   :  { %v284_v45 = vpack.c.bf16 %v207_v44, %v205_v42 }
  0xd9   :  { %380 = vmatmul.bf16.gmra.mxu1 %v284_v45 }
  0xdc   :  { %v227_v46 = vpop.f32.mrf.mxu2 }
  0xdd   :  { %v288_v47 = vpack.c.bf16 %v227_v46, %v225_v43 }
  0xdf   :  { %400 = vmatmul.bf16.gmra.mxu3 %v288_v47 }
 0x126   :  { %v366_v51 = vpop.f32.mrf.mxu1 }
 0x127   :  { %v367_v52 = vadd.f32 %v908_v50, %v366_v51 }
 0x129   :  { %v914_v53 = vsel %vm408_vm0, %v367_v52, -1e+30 }
 0x12a   :  { %425 = vmax.xlane.f32.xlu0 %v914_v53 }
 0x12e   :  { %v368_v54 = vpop.f32.mrf.mxu1 }
 0x12f   :  { %v369_v55 = vadd.f32 %v908_v50, %v368_v54 }
 0x131   :  { %v920_v56 = vsel %vm408_vm0, %v369_v55, -1e+30 }
 0x132   :  { %v386_v57 = vpop.f32.mrf.mxu3  ;;  %427 = vmax.xlane.f32.xlu0 %v920_v56 }
 0x133   :  { %v387_v58 = vadd.f32 %v908_v50, %v386_v57 }
 0x135   :  { %v926_v59 = vsel %vm408_vm0, %v387_v58, -1e+30 }
 0x136   :  { %441 = vmax.xlane.f32.xlu2 %v926_v59  ;;  %v371_v60 = vpop.f32.mrf.mxu1 }
 0x137   :  { %v372_v61 = vadd.f32 %v908_v50, %v371_v60 }
 0x139   :  { %v932_v62 = vsel %vm408_vm0, %v372_v61, -1e+30 }
 0x13a   :  { %v388_v63 = vpop.f32.mrf.mxu3  ;;  %429 = vmax.xlane.f32.xlu1 %v932_v62 }
 0x13b   :  { %v389_v0 = vadd.f32 %v908_v50, %v388_v63 }
 0x13d   :  { %v938_v1 = vsel %vm408_vm0, %v389_v0, -1e+30 }
 0x13e   :  { %443 = vmax.xlane.f32.xlu0 %v938_v1  ;;  %v373_v2 = vpop.f32.mrf.mxu1 }
 0x13f   :  { %v374_v3 = vadd.f32 %v908_v50, %v373_v2 }
 0x141   :  { %v944_v4 = vsel %vm408_vm0, %v374_v3, -1e+30 }
 0x142   :  { %v391_v5 = vpop.f32.mrf.mxu3  ;;  %431 = vmax.xlane.f32.xlu1 %v944_v4 }
 0x143   :  { %v392_v6 = vadd.f32 %v908_v50, %v391_v5 }
 0x145   :  { %v951_v9 = vsel %vm408_vm0, %v392_v6, -1e+30 }
 0x146   :  { %v376_v7 = vpop.f32.mrf.mxu1 }
 0x147   :  { %v377_v8 = vadd.f32 %v908_v50, %v376_v7 }
 0x149   :  { %v955_v10 = vsel %vm408_vm0, %v377_v8, -1e+30 }
 0x14a   :  { %v393_v11 = vpop.f32.mrf.mxu3  ;;  %445 = vmax.xlane.f32.xlu1 %v951_v9  ;;  %433 = vmax.xlane.f32.xlu2 %v955_v10 }
 0x14b   :  { %v394_v12 = vadd.f32 %v908_v50, %v393_v11 }
 0x14d   :  { %v962_v14 = vsel %vm408_vm0, %v394_v12, -1e+30 }
 0x14e   :  { %v378_v13 = vpop.f32.mrf.mxu1 }
 0x14f   :  { %v379_v17 = vadd.f32 %v908_v50, %v378_v13 }
 0x151   :  { %v975_v21 = vsel %vm408_vm0, %v379_v17, -1e+30 }
 0x152   :  { %v396_v15 = vpop.f32.mrf.mxu3  ;;  %447 = vmax.xlane.f32.xlu2 %v962_v14 }
 0x153   :  { %v397_v16 = vadd.f32 %v908_v50, %v396_v15 }
 0x155   :  { %v969_v18 = vsel %vm408_vm0, %v397_v16, -1e+30 }
 0x156   :  { %449 = vmax.xlane.f32.xlu0 %v969_v18  ;;  %v381_v19 = vpop.f32.mrf.mxu1 }
 0x157   :  { %v382_v20 = vadd.f32 %v908_v50, %v381_v19 }
 0x159   :  { %v980_v23 = vsel %vm408_vm0, %v382_v20, -1e+30 }
 0x15a   :  { %v398_v22 = vpop.f32.mrf.mxu3  ;;  %435 = vmax.xlane.f32.xlu2 %v975_v21 }
 0x15b   :  { %v399_v29 = vadd.f32 %v908_v50, %v398_v22 }
 0x15d   :  { %v998_v31 = vsel %vm408_vm0, %v399_v29, -1e+30 }
 0x15e   :  { %v383_v24 = vpop.f32.mrf.mxu1  ;;  %437 = vmax.xlane.f32.xlu0 %v980_v23 }
 0x15f   :  { %v384_v25 = vadd.f32 %v908_v50, %v383_v24 }
 0x161   :  { %v986_v26 = vsel %vm408_vm0, %v384_v25, -1e+30 }
 0x162   :  { %v401_v27 = vpop.f32.mrf.mxu3  ;;  %439 = vmax.xlane.f32.xlu1 %v986_v26 }
 0x163   :  { %v402_v28 = vadd.f32 %v908_v50, %v401_v27 }
 0x165   :  { %v993_v30 = vsel %vm408_vm0, %v402_v28, -1e+30 }
 0x166   :  { %453 = vmax.xlane.f32.xlu2 %v993_v30 }
 0x16a   :  { %v403_v32 = vpop.f32.mrf.mxu3  ;;  %451 = vmax.xlane.f32.xlu1 %v998_v31 }
 0x16b   :  { %v404_v33 = vadd.f32 %v908_v50, %v403_v32 }
 0x16d   :  { %v1004_v34 = vsel %vm408_vm0, %v404_v33, -1e+30 }
 0x16e   :  { %455 = vmax.xlane.f32.xlu0 %v1004_v34 }
 0x19d   :  { %v426_v35 = vpop.xlane.xlu0 %425 }
 0x19e   :  { %v1008_v36 = vsub.f32 %v914_v53, %v426_v35 }
 0x1a0   :  { %v473_v37 = vmul.f32 1.442695, %v1008_v36 }
 0x1a2   :  { %742 = vpow2.f32 %v473_v37 }
 0x1a5   :  { %v428_v38 = vpop.xlane.xlu0 %427 }
 0x1a6   :  { %v1012_v39 = vsub.f32 %v920_v56, %v428_v38 }
 0x1a8   :  { %v743_v40 = vpop.eup %742  ;;  %v475_v41 = vmul.f32 1.442695, %v1012_v39 }
 0x1a9   :  { %v442_v42 = vpop.xlane.xlu2 %441  ;;  %505 = vadd.xlane.f32.xlu1 %v743_v40 }
 0x1aa   :  { %744 = vpow2.f32 %v475_v41  ;;  %v1016_v43 = vsub.f32 %v926_v59, %v442_v42 }
 0x1ac   :  { %v489_v44 = vmul.f32 1.442695, %v1016_v43 }
 0x1ad   :  { %v430_v45 = vpop.xlane.xlu1 %429 }
 0x1ae   :  { %746 = vpow2.f32 %v489_v44  ;;  %v1020_v46 = vsub.f32 %v932_v62, %v430_v45 }
 0x1b0   :  { %v745_v47 = vpop.eup %744  ;;  %v477_v48 = vmul.f32 1.442695, %v1020_v46 }
 0x1b1   :  { %v444_v49 = vpop.xlane.xlu0 %443  ;;  %507 = vadd.xlane.f32.xlu2 %v745_v47 }
 0x1b2   :  { %v1024_v50 = vsub.f32 %v938_v1, %v444_v49  ;;  %748 = vpow2.f32 %v477_v48 }
 0x1b4   :  { %v747_v51 = vpop.eup %746  ;;  %v491_v52 = vmul.f32 1.442695, %v1024_v50 }
 0x1b5   :  { %v432_v53 = vpop.xlane.xlu1 %431  ;;  %521 = vadd.xlane.f32.xlu0 %v747_v51 }
 0x1b6   :  { %750 = vpow2.f32 %v491_v52  ;;  %v1028_v54 = vsub.f32 %v944_v4, %v432_v53 }
 0x1b8   :  { %v479_v55 = vmul.f32 1.442695, %v1028_v54  ;;  %v749_v56 = vpop.eup %748 }
 0x1ba   :  { %752 = vpow2.f32 %v479_v55 }
 0x1bc   :  { %v751_v57 = vpop.eup %750 }
 0x1bd   :  { %v446_v58 = vpop.xlane.xlu1 %445  ;;  %v434_v59 = vpop.xlane.xlu2 %433  ;;  %523 = vadd.xlane.f32.xlu1 %v751_v57  ;;  %509 = vadd.xlane.f32.xlu0 %v749_v56 }
 0x1be   :  { %v1032_v60 = vsub.f32 %v951_v9, %v446_v58  ;;  %v1036_v62 = vsub.f32 %v955_v10, %v434_v59 }
 0x1c0   :  { %v493_v61 = vmul.f32 1.442695, %v1032_v60  ;;  %v753_v63 = vpop.eup %752  ;;  %v481_v0 = vmul.f32 1.442695, %v1036_v62 }
 0x1c2   :  { %754 = vpow2.f32 %v493_v61 }
 0x1c3   :  { %756 = vpow2.f32 %v481_v0 }
 0x1c5   :  { %v448_v1 = vpop.xlane.xlu2 %447  ;;  %511 = vadd.xlane.f32.xlu1 %v753_v63 }
 0x1c6   :  { %v1040_v2 = vsub.f32 %v962_v14, %v448_v1 }
 0x1c8   :  { %v755_v3 = vpop.eup %754  ;;  %v495_v4 = vmul.f32 1.442695, %v1040_v2 }
 0x1c9   :  { %v450_v5 = vpop.xlane.xlu0 %449  ;;  %525 = vadd.xlane.f32.xlu2 %v755_v3  ;;  %v757_v10 = vpop.eup %756 }
 0x1ca   :  { %758 = vpow2.f32 %v495_v4  ;;  %v1044_v6 = vsub.f32 %v969_v18, %v450_v5 }
 0x1cc   :  { %v497_v7 = vmul.f32 1.442695, %v1044_v6 }
 0x1cd   :  { %v436_v8 = vpop.xlane.xlu2 %435 }
 0x1ce   :  { %760 = vpow2.f32 %v497_v7  ;;  %v1048_v9 = vsub.f32 %v975_v21, %v436_v8 }
 0x1d0   :  { %v759_v11 = vpop.eup %758  ;;  %v483_v12 = vmul.f32 1.442695, %v1048_v9 }
 0x1d1   :  { %513 = vadd.xlane.f32.xlu2 %v757_v10  ;;  %527 = vadd.xlane.f32.xlu0 %v759_v11  ;;  %v438_v13 = vpop.xlane.xlu0 %437 }
 0x1d2   :  { %762 = vpow2.f32 %v483_v12  ;;  %v1052_v14 = vsub.f32 %v980_v23, %v438_v13 }
 0x1d4   :  { %v761_v15 = vpop.eup %760  ;;  %v485_v16 = vmul.f32 1.442695, %v1052_v14 }
 0x1d5   :  { %529 = vadd.xlane.f32.xlu1 %v761_v15  ;;  %v440_v17 = vpop.xlane.xlu1 %439 }
 0x1d6   :  { %764 = vpow2.f32 %v485_v16  ;;  %v1056_v18 = vsub.f32 %v986_v26, %v440_v17 }
 0x1d8   :  { %v763_v19 = vpop.eup %762  ;;  %v487_v20 = vmul.f32 1.442695, %v1056_v18 }
 0x1d9   :  { %v454_v21 = vpop.xlane.xlu2 %453  ;;  %515 = vadd.xlane.f32.xlu0 %v763_v19 }
 0x1da   :  { %766 = vpow2.f32 %v487_v20  ;;  %v1060_v22 = vsub.f32 %v993_v30, %v454_v21 }
 0x1dc   :  { %v765_v23 = vpop.eup %764  ;;  %v501_v24 = vmul.f32 1.442695, %v1060_v22 }
 0x1dd   :  { %v452_v25 = vpop.xlane.xlu1 %451  ;;  %517 = vadd.xlane.f32.xlu1 %v765_v23 }
 0x1de   :  { %768 = vpow2.f32 %v501_v24  ;;  %v1064_v27 = vsub.f32 %v998_v31, %v452_v25 }
 0x1e0   :  { %v767_v26 = vpop.eup %766  ;;  %v499_v28 = vmul.f32 1.442695, %v1064_v27 }
 0x1e1   :  { %519 = vadd.xlane.f32.xlu2 %v767_v26  ;;  %v456_v29 = vpop.xlane.xlu0 %455 }
 0x1e2   :  { %770 = vpow2.f32 %v499_v28  ;;  %v1068_v32 = vsub.f32 %v1004_v34, %v456_v29 }
 0x1e4   :  { %v769_v30 = vpop.eup %768  ;;  %v503_v33 = vmul.f32 1.442695, %v1068_v32 }
 0x1e5   :  { %533 = vadd.xlane.f32.xlu0 %v769_v30 }
 0x1e6   :  { %772 = vpow2.f32 %v503_v33 }
 0x1e8   :  { %v771_v35 = vpop.eup %770 }
 0x1e9   :  { %531 = vadd.xlane.f32.xlu2 %v771_v35 }
 0x1ec   :  { %v773_v37 = vpop.eup %772 }
 0x1ed   :  { %535 = vadd.xlane.f32.xlu1 %v773_v37 }
 0x21c   :  { %v506_v31 = vpop.xlane.xlu1 %505 }
 0x21d   :  { %774 = vlog2.f32 %v506_v31 }
 0x223   :  { %v775_v38 = vpop.eup %774 }
 0x224   :  { %v538_v40 = vmul.f32 0.6931472, %v775_v38  ;;  %v508_v41 = vpop.xlane.xlu2 %507 }
 0x225   :  { %776 = vlog2.f32 %v508_v41 }
 0x226   :  { %v569_v42 = vsub.f32 %v1008_v36, %v538_v40 }
 0x228   :  { %585 = vst [vmem:[%s1139_s4] sm:$0xff] %v569_v42  ;;  %v522_v34 = vpop.xlane.xlu0 %521 }
 0x229   :  { %778 = vlog2.f32 %v522_v34 }
 0x22b   :  { %v777_v44 = vpop.eup %776 }
 0x22c   :  { %v540_v45 = vmul.f32 0.6931472, %v777_v44 }
 0x22e   :  { %v570_v47 = vsub.f32 %v1012_v39, %v540_v45 }
 0x22f   :  { %v779_v48 = vpop.eup %778 }
 0x230   :  { %586 = vst [vmem:[%s1139_s4 + $0x8] sm:$0xff] %v570_v47  ;;  %v554_v49 = vmul.f32 0.6931472, %v779_v48  ;;  %v524_v51 = vpop.xlane.xlu1 %523  ;;  %v510_v52 = vpop.xlane.xlu0 %509 }
 0x231   :  { %780 = vlog2.f32 %v524_v51 }
 0x232   :  { %v577_v36 = vsub.f32 %v1016_v43, %v554_v49  ;;  %782 = vlog2.f32 %v510_v52 }
 0x234   :  { %593 = vst [vmem:[%s1139_s4 + $0x40] sm:$0xff] %v577_v36 }
 0x237   :  { %v781_v53 = vpop.eup %780 }
 0x238   :  { %v783_v55 = vpop.eup %782  ;;  %v556_v56 = vmul.f32 0.6931472, %v781_v53  ;;  %v512_v39 = vpop.xlane.xlu1 %511 }
 0x239   :  { %v542_v57 = vmul.f32 0.6931472, %v783_v55  ;;  %784 = vlog2.f32 %v512_v39 }
 0x23a   :  { %v578_v58 = vsub.f32 %v1024_v50, %v556_v56 }
 0x23b   :  { %v571_v59 = vsub.f32 %v1020_v46, %v542_v57 }
 0x23c   :  { %594 = vst [vmem:[%s1139_s4 + $0x48] sm:$0xff] %v578_v58  ;;  %v526_v43 = vpop.xlane.xlu2 %525 }
 0x23d   :  { %587 = vst [vmem:[%s1139_s4 + $0x10] sm:$0xff] %v571_v59  ;;  %786 = vlog2.f32 %v526_v43 }
 0x23f   :  { %v785_v61 = vpop.eup %784 }
 0x240   :  { %v544_v63 = vmul.f32 0.6931472, %v785_v61 }
 0x242   :  { %v572_v0 = vsub.f32 %v1028_v54, %v544_v63 }
 0x243   :  { %v787_v1 = vpop.eup %786 }
 0x244   :  { %588 = vst [vmem:[%s1139_s4 + $0x18] sm:$0xff] %v572_v0  ;;  %v558_v46 = vmul.f32 0.6931472, %v787_v1  ;;  %v514_v50 = vpop.xlane.xlu2 %513  ;;  %v528_v3 = vpop.xlane.xlu0 %527 }
 0x245   :  { %788 = vlog2.f32 %v514_v50 }
 0x246   :  { %v579_v4 = vsub.f32 %v1032_v60, %v558_v46  ;;  %790 = vlog2.f32 %v528_v3 }
 0x248   :  { %595 = vst [vmem:[%s1139_s4 + $0x50] sm:$0xff] %v579_v4  ;;  %v530_v5 = vpop.xlane.xlu1 %529 }
 0x249   :  { %792 = vlog2.f32 %v530_v5 }
 0x24b   :  { %v789_v7 = vpop.eup %788 }
 0x24c   :  { %v791_v54 = vpop.eup %790  ;;  %v546_v8 = vmul.f32 0.6931472, %v789_v7  ;;  %v516_v10 = vpop.xlane.xlu0 %515 }
 0x24d   :  { %v560_v11 = vmul.f32 0.6931472, %v791_v54  ;;  %794 = vlog2.f32 %v516_v10 }
 0x24e   :  { %v573_v12 = vsub.f32 %v1036_v62, %v546_v8 }
 0x24f   :  { %v793_v13 = vpop.eup %792  ;;  %v580_v15 = vsub.f32 %v1040_v2, %v560_v11 }
 0x250   :  { %589 = vst [vmem:[%s1139_s4 + $0x20] sm:$0xff] %v573_v12  ;;  %v562_v60 = vmul.f32 0.6931472, %v793_v13  ;;  %v518_v16 = vpop.xlane.xlu1 %517 }
 0x251   :  { %596 = vst [vmem:[%s1139_s4 + $0x58] sm:$0xff] %v580_v15  ;;  %796 = vlog2.f32 %v518_v16 }
 0x252   :  { %v581_v17 = vsub.f32 %v1044_v6, %v562_v60 }
 0x253   :  { %v795_v19 = vpop.eup %794 }
 0x254   :  { %597 = vst [vmem:[%s1139_s4 + $0x60] sm:$0xff] %v581_v17  ;;  %v548_v62 = vmul.f32 0.6931472, %v795_v19  ;;  %v520_v2 = vpop.xlane.xlu2 %519 }
 0x255   :  { %798 = vlog2.f32 %v520_v2 }
 0x256   :  { %v574_v20 = vsub.f32 %v1048_v9, %v548_v62 }
 0x257   :  { %v797_v21 = vpop.eup %796 }
 0x258   :  { %590 = vst [vmem:[%s1139_s4 + $0x28] sm:$0xff] %v574_v20  ;;  %v550_v23 = vmul.f32 0.6931472, %v797_v21  ;;  %v534_v24 = vpop.xlane.xlu0 %533 }
 0x259   :  { %800 = vlog2.f32 %v534_v24 }
 0x25a   :  { %v575_v6 = vsub.f32 %v1052_v14, %v550_v23 }
 0x25b   :  { %v799_v25 = vpop.eup %798 }
 0x25c   :  { %591 = vst [vmem:[%s1139_s4 + $0x30] sm:$0xff] %v575_v6  ;;  %v552_v26 = vmul.f32 0.6931472, %v799_v25  ;;  %v532_v28 = vpop.xlane.xlu2 %531 }
 0x25d   :  { %802 = vlog2.f32 %v532_v28 }
 0x25e   :  { %v576_v9 = vsub.f32 %v1056_v18, %v552_v26 }
 0x25f   :  { %v801_v29 = vpop.eup %800 }
 0x260   :  { %592 = vst [vmem:[%s1139_s4 + $0x38] sm:$0xff] %v576_v9  ;;  %v566_v30 = vmul.f32 0.6931472, %v801_v29  ;;  %v536_v33 = vpop.xlane.xlu1 %535 }
 0x261   :  { %804 = vlog2.f32 %v536_v33 }
 0x262   :  { %v583_v14 = vsub.f32 %v1060_v22, %v566_v30 }
 0x263   :  { %v803_v35 = vpop.eup %802 }
 0x264   :  { %599 = vst [vmem:[%s1139_s4 + $0x70] sm:$0xff] %v583_v14  ;;  %v564_v37 = vmul.f32 0.6931472, %v803_v35 }
 0x266   :  { %v582_v31 = vsub.f32 %v1064_v27, %v564_v37 }
 0x267   :  { %v805_v38 = vpop.eup %804 }
 0x268   :  { %598 = vst [vmem:[%s1139_s4 + $0x68] sm:$0xff] %v582_v31  ;;  %v568_v18 = vmul.f32 0.6931472, %v805_v38 }
 0x26a   :  { %v584_v40 = vsub.f32 %v1068_v32, %v568_v18 }
 0x26c   :  { %600 = vst [vmem:[%s1139_s4 + $0x78] sm:$0xff] %v584_v40 }

</bundles_post_ra>
